<compile_context>
chip_gen: v7x
topology: tpu7x:2x2x1
jax: 0.10.0
libtpu: 0.0.40
codegen_flags: <defaults>
</compile_context>

<pallas_src>
import jax
import jax.numpy as jnp
from jax.experimental import pallas as pl
from jax.experimental.pallas import tpu as pltpu

_VMEM = pltpu.MemorySpace.VMEM
_SMEM = pltpu.MemorySpace.SMEM
_NT_BUCKET = 128  # fixed lane-aligned bucket for the fg_sim query count


# ----------------------------------------------------------------------------
# Pallas kernels
# ----------------------------------------------------------------------------
def _weighted_ce_kernel(logits_ref, targets_ref, weight_ref, out_ref):
    """Weighted softmax cross-entropy, batched over decoder layers.

    logits_ref : (G, C+1, N) f32  -- N (flattened queries) on the lane axis
    targets_ref: (G, 1,   N) i32
    weight_ref : (C+1, 1)   f32
    out_ref    : (G, 1)     f32   -- per-layer weighted-mean CE
    """
    x = logits_ref[...]
    tgt = targets_ref[...]
    w = weight_ref[...]
    g, c1, n = x.shape
    cls = jax.lax.broadcasted_iota(jnp.int32, (g, c1, n), 1)
    onehot = (cls == tgt).astype(jnp.float32)                     # (G, C+1, N)
    m = jnp.max(x, axis=1, keepdims=True)                         # (G, 1, N)
    lse = m + jnp.log(jnp.sum(jnp.exp(x - m), axis=1, keepdims=True))
    tgt_logit = jnp.sum(onehot * x, axis=1, keepdims=True)        # (G, 1, N)
    wt = jnp.sum(onehot * w[None, :, :], axis=1, keepdims=True)   # weight[target]
    num = jnp.sum(wt * (lse - tgt_logit), axis=2)                 # (G, 1)
    den = jnp.sum(wt, axis=2)                                     # (G, 1)
    out_ref[...] = num / den


def _mask_loss_kernel(logits_ref, labels_ref, nm_ref, ce_ref, dice_ref):
    """sigmoid_ce_loss + dice_loss over sampled points, batched over layers.

    logits/labels: (G, Nm, T*P) bf16 (cast to f32 in-kernel)
    nm_ref       : SMEM (1,) f32  -- num_masks
    ce/dice      : (G, 1) f32
    """
    x = logits_ref[...].astype(jnp.float32)
    y = labels_ref[...].astype(jnp.float32)
    inv_nm = 1.0 / nm_ref[0]
    # one EUP exp shared by softplus and sigmoid
    e = jnp.exp(-jnp.abs(x))
    bce = jnp.maximum(x, 0.0) - x * y + jnp.log1p(e)
    ce = jnp.sum(jnp.mean(bce, axis=2), axis=1, keepdims=True) * inv_nm
    r = pl.reciprocal(1.0 + e, approx=True)
    s = jnp.where(x >= 0.0, r, e * r)                 # sigmoid(x) from e
    numer = 2.0 * jnp.sum(s * y, axis=2)              # (G, Nm)
    denom = jnp.sum(s, axis=2) + jnp.sum(y, axis=2)   # (G, Nm)
    dl = 1.0 - (numer + 1.0) / (denom + 1.0)
    dice = jnp.sum(dl, axis=1, keepdims=True) * inv_nm
    ce_ref[...] = ce
    dice_ref[...] = dice
    # TODO(synk): for production-scale Nm*T*P slabs on v7x (64 MiB VMEM), tile
    # the row axis with a grid + partial sums and raise vmem_limit_bytes.


def _fg_sim_kernel(q_ref, idc_ref, idr_ref, bc_ref, br_ref, nv_ref, out_ref):
    """sim = q @ q.T (bf16 MXU), masked BCE normalized by same-clip count.

    q_ref: (Npad, C) bf16, ids/bidx as int32 column (Npad,1) / row (1,Npad),
    nv_ref: SMEM (1,) i32 valid count, out_ref: SMEM (1,) f32.
    """
    sim = jax.lax.dot_general(q_ref[...], q_ref[...], (((1,), (1,)), ((), ())),
                              preferred_element_type=jnp.float32)   # (Npad, Npad)
    npad = sim.shape[0]
    nv = nv_ref[0]
    row = jax.lax.broadcasted_iota(jnp.int32, (npad, npad), 0)
    col = jax.lax.broadcasted_iota(jnp.int32, (npad, npad), 1)
    valid = (row < nv) & (col < nv)
    same_clip = ((bc_ref[...] == br_ref[...]) & valid).astype(jnp.float32)
    sim_tgt = (idc_ref[...] == idr_ref[...]).astype(jnp.float32)
    e = jnp.exp(-jnp.abs(sim))
    bce = jnp.maximum(sim, 0.0) - sim * sim_tgt + jnp.log1p(e)
    out_ref[0] = jnp.sum(bce * same_clip) / (jnp.sum(same_clip) + 1e-6)


# ----------------------------------------------------------------------------
# Kernel wrappers
# ----------------------------------------------------------------------------
def batched_weighted_ce(logits_t_stack, targets_stack, weight):
    """logits_t_stack (G, C+1, N) f32, targets_stack (G, 1, N) i32 -> (G,) CE."""
    g, c1, _ = logits_t_stack.shape
    out = pl.pallas_call(
        _weighted_ce_kernel,
        out_shape=jax.ShapeDtypeStruct((g, 1), jnp.float32),
        in_specs=[pl.BlockSpec(memory_space=_VMEM)] * 3,
        out_specs=pl.BlockSpec(memory_space=_VMEM),
    )(logits_t_stack.astype(jnp.float32),
      targets_stack.astype(jnp.int32),
      weight.astype(jnp.float32).reshape(c1, 1))
    return out[:, 0]


def batched_mask_losses(point_logits_stack, point_labels_stack, num_masks):
    """point stacks (G, Nm, T*P) -> per-layer (ce, dice), each (G,)."""
    g = point_logits_stack.shape[0]
    ce, dice = pl.pallas_call(
        _mask_loss_kernel,
        out_shape=(jax.ShapeDtypeStruct((g, 1), jnp.float32),
                   jax.ShapeDtypeStruct((g, 1), jnp.float32)),
        in_specs=[pl.BlockSpec(memory_space=_VMEM),
                  pl.BlockSpec(memory_space=_VMEM),
                  pl.BlockSpec(memory_space=_SMEM)],
        out_specs=(pl.BlockSpec(memory_space=_VMEM),
                   pl.BlockSpec(memory_space=_VMEM)),
    )(point_logits_stack.astype(jnp.bfloat16),
      point_labels_stack.astype(jnp.bfloat16),
      jnp.asarray([num_masks], jnp.float32))
    return ce[:, 0], dice[:, 0]


def fg_sim_loss(q, ids, bidx):
    nt, c = q.shape
    npad = ((nt + _NT_BUCKET - 1) // _NT_BUCKET) * _NT_BUCKET
    q_p = jnp.zeros((npad, c), jnp.bfloat16).at[:nt].set(q.astype(jnp.bfloat16))
    ids_p = jnp.full((npad,), -1, jnp.int32).at[:nt].set(ids.astype(jnp.int32))
    b_p = jnp.full((npad,), -1, jnp.int32).at[:nt].set(bidx.astype(jnp.int32))
    out = pl.pallas_call(
        _fg_sim_kernel,
        out_shape=jax.ShapeDtypeStruct((1,), jnp.float32),
        in_specs=[pl.BlockSpec(memory_space=_VMEM)] * 5
                 + [pl.BlockSpec(memory_space=_SMEM)],
        out_specs=pl.BlockSpec(memory_space=_SMEM),
    )(q_p,
      ids_p.reshape(npad, 1), ids_p.reshape(1, npad),
      b_p.reshape(npad, 1), b_p.reshape(1, npad),
      jnp.asarray([nt], jnp.int32))
    return out[0]


# ----------------------------------------------------------------------------
# Plain-JAX glue: point sampling (grid_sample, align_corners=False, zero pad)
# ----------------------------------------------------------------------------
# TODO(synk): the bilinear gather below is the real HBM-heavy path at production
# scale; a fused Pallas point-sample kernel (masks in pl.ANY + per-row DMA) would
# remove one full HBM round trip of the sampled logits/labels.
def point_sample(inp, coords):
    # inp: (R, 1, H, W), coords: (R, P, 2) in [0,1] (x, y); returns (R, 1, P)
    r, _, h, w = inp.shape
    grid = 2.0 * coords - 1.0
    ix = ((grid[..., 0] + 1.0) * w - 1.0) / 2.0
    iy = ((grid[..., 1] + 1.0) * h - 1.0) / 2.0
    x0 = jnp.floor(ix)
    y0 = jnp.floor(iy)
    x1 = x0 + 1.0
    y1 = y0 + 1.0
    wx1 = ix - x0
    wx0 = 1.0 - wx1
    wy1 = iy - y0
    wy0 = 1.0 - wy1
    ridx = jnp.arange(r)[:, None]

    def gather(xi, yi):
        valid = (xi >= 0) & (xi <= w - 1) & (yi >= 0) & (yi <= h - 1)
        xc = jnp.clip(xi, 0, w - 1).astype(jnp.int32)
        yc = jnp.clip(yi, 0, h - 1).astype(jnp.int32)
        vals = inp[ridx, 0, yc, xc]
        return vals * valid.astype(inp.dtype)

    out = (gather(x0, y0) * (wx0 * wy0) + gather(x1, y0) * (wx1 * wy0)
           + gather(x0, y1) * (wx0 * wy1) + gather(x1, y1) * (wx1 * wy1))
    return out[:, None, :]


def calculate_uncertainty(logits):
    return -jnp.abs(logits)


def get_uncertain_point_coords_with_randomness(key, logits, num_points,
                                               oversample_ratio,
                                               importance_sample_ratio):
    r = logits.shape[0]
    num_sampled = int(num_points * oversample_ratio)
    k1, k2 = jax.random.split(key)
    coords = jax.random.uniform(k1, (r, num_sampled, 2), dtype=jnp.float32)
    pt_logits = point_sample(logits, coords)                    # (R, 1, S)
    unc = calculate_uncertainty(pt_logits)[:, 0, :]             # (R, S)
    num_uncertain = int(importance_sample_ratio * num_points)
    num_random = num_points - num_uncertain
    _, idx = jax.lax.top_k(unc, num_uncertain)
    idx_b = jnp.broadcast_to(idx[..., None], (r, num_uncertain, 2))
    sel = jnp.take_along_axis(coords, idx_b, axis=1)
    if num_random > 0:
        rnd = jax.random.uniform(k2, (r, num_random, 2), dtype=jnp.float32)
        sel = jnp.concatenate([sel, rnd], axis=1)
    return sel


# ----------------------------------------------------------------------------
# Criterion (JAX/Pallas re-implementation of AvismSetCriterion.forward)
# ----------------------------------------------------------------------------
class IdentityMatcher:
    # TODO(synk): Hungarian matcher is an external module; replaced by a
    # deterministic identity matching (query i <-> target i) for this synthetic kernel.
    def __call__(self, outputs, targets):
        L = outputs['pred_logits'].shape[0]
        inds = []
        for _ in range(L):
            for t in targets:
                n = int(t['labels'].shape[0])
                inds.append((jnp.arange(n, dtype=jnp.int32),
                             jnp.arange(n, dtype=jnp.int32)))
        return inds


class AvismSetCriterionPallas:
    def __init__(self, num_classes, matcher, weight_dict, eos_coef, losses,
                 num_points, oversample_ratio, importance_sample_ratio,
                 sim_use_clip):
        self.num_classes = num_classes
        self.matcher = matcher
        self.weight_dict = weight_dict
        self.eos_coef = eos_coef
        self.losses = losses
        self.num_points = num_points
        self.oversample_ratio = oversample_ratio
        self.importance_sample_ratio = importance_sample_ratio
        self.sim_use_clip = sim_use_clip
        # deterministic parameter init (matches torch buffer 'empty_weight')
        self.empty_weight = jnp.ones((num_classes + 1,), jnp.float32).at[-1].set(eos_coef)

    def _get_src_permutation_idx(self, indices):
        batch_idx = jnp.concatenate(
            [jnp.full_like(src, i) for i, (src, _) in enumerate(indices)])
        src_idx = jnp.concatenate([src for src, _ in indices])
        return batch_idx, src_idx

    # ---- per-layer glue (gather / flatten / point-sample) --------------------
    def _prep_labels(self, outputs, targets, indices):
        src_logits = outputs['pred_logits']
        L, B, cQ, C1 = src_logits.shape
        src_logits = src_logits.reshape(L * B, cQ, C1)
        batch_idx, src_idx = self._get_src_permutation_idx(indices)
        target_classes_o = jnp.concatenate(
            [t['labels'][J] for t, (_, J) in zip(targets * L, indices)])
        target_classes = jnp.full((L * B, cQ), self.num_classes, dtype=jnp.int32)
        target_classes = target_classes.at[batch_idx, src_idx].set(
            target_classes_o.astype(jnp.int32))
        # transpose to (C+1, N): N (queries) lane-dense inside the kernel
        logits_t = src_logits.reshape(L * B * cQ, C1).T.astype(jnp.float32)
        targets_flat = target_classes.reshape(1, L * B * cQ)
        return logits_t, targets_flat

    def _prep_masks(self, outputs, targets, indices, key):
        batch_idx, src_idx = self._get_src_permutation_idx(indices)
        src_masks = outputs['pred_masks']
        L, B, cQ, T, H, W = src_masks.shape
        src_masks = src_masks.reshape(L * B, cQ, T, H, W)[batch_idx, src_idx]
        target_masks = jnp.concatenate(
            [t['masks'][i] for t, (_, i) in zip(targets * L, indices)]
        ).astype(src_masks.dtype)
        nm = src_masks.shape[0]
        src_masks = src_masks.reshape(nm * T, 1, H, W)
        target_masks = target_masks.reshape(nm * T, 1, H, W)
        # no-grad point selection (random + importance sampling)
        point_coords = get_uncertain_point_coords_with_randomness(
            key, src_masks, self.num_points, self.oversample_ratio,
            self.importance_sample_ratio)
        point_labels = point_sample(target_masks, point_coords)[:, 0, :]
        point_logits = point_sample(src_masks, point_coords)[:, 0, :]
        point_logits = point_logits.reshape(nm, T * self.num_points)
        point_labels = point_labels.reshape(nm, T * self.num_points)
        # bf16 halves HBM->VMEM bytes; math is done in f32 inside the kernel
        return point_logits.astype(jnp.bfloat16), point_labels.astype(jnp.bfloat16)

    # ---- fg similarity loss ---------------------------------------------------
    def loss_fg_sim(self, outputs, clip_targets, frame_targets, clip_indices,
                    frame_indices, num_masks, MULTIPLIER=1000):
        total_src_q, total_tgt_ids, total_batch_idx = [], [], []
        src_fq = outputs['pred_fq_embed']
        L, B, T, fQ, C = src_fq.shape
        src_fq = src_fq.reshape(L * B * T, fQ, C)
        frame_indices_flat = sum(frame_indices, [])
        fb_idx, fs_idx = self._get_src_permutation_idx(frame_indices_flat)
        src_fq = src_fq[fb_idx, fs_idx]
        target_frame_ids = jnp.concatenate(
            [t['ids'][J] for t, (_, J) in zip(frame_targets * L, frame_indices_flat)])
        # matches PyTorch: floor-divide the flattened (L*B*T) index by T
        frame_batch_idx = fb_idx // T
        is_frame_valid = target_frame_ids != -1
        target_frame_ids = target_frame_ids + frame_batch_idx * MULTIPLIER
        # TODO(synk): boolean compaction below is eager-only (data-dependent shape);
        # the Pallas kernel itself sees a fixed 128-aligned bucket.
        total_src_q.append(src_fq[is_frame_valid])
        total_tgt_ids.append(target_frame_ids[is_frame_valid])
        total_batch_idx.append(frame_batch_idx[is_frame_valid])

        if self.sim_use_clip:
            src_cq = outputs['pred_cq_embed']
            src_cq = src_cq.reshape(L * B, -1, C)
            cb_idx, cs_idx = self._get_src_permutation_idx(clip_indices)
            src_cq = src_cq[cb_idx, cs_idx]
            target_clip_ids = jnp.concatenate(
                [t['ids'][J] for t, (_, J) in zip(clip_targets * L, clip_indices)]
            ).max(axis=1)
            clip_batch_idx = cb_idx
            is_clip_valid = target_clip_ids != -1
            target_clip_ids = target_clip_ids + clip_batch_idx * MULTIPLIER
            total_src_q.append(src_cq[is_clip_valid])
            total_tgt_ids.append(target_clip_ids[is_clip_valid])
            total_batch_idx.append(clip_batch_idx[is_clip_valid])

        total_src_q = jnp.concatenate(total_src_q)
        total_tgt_ids = jnp.concatenate(total_tgt_ids)
        total_batch_idx = jnp.concatenate(total_batch_idx)
        return {'loss_clip_sim': fg_sim_loss(total_src_q, total_tgt_ids,
                                             total_batch_idx)}

    # ---- forward --------------------------------------------------------------
    def forward(self, outputs, clip_targets, frame_targets, frame_indices=None,
                key=None):
        outputs_without_aux = {k: v for k, v in outputs.items() if k != 'aux_outputs'}
        clip_indices = self.matcher(outputs_without_aux, clip_targets)
        num_masks = (sum(int(t['labels'].shape[0]) for t in clip_targets)
                     * outputs_without_aux['pred_masks'].shape[0])
        # TODO(synk): distributed all_reduce / world_size omitted (single host).
        num_masks = max(float(num_masks), 1.0)

        aux_outputs = outputs.get('aux_outputs', [])
        layer_outputs = [outputs_without_aux] + list(aux_outputs)
        layer_indices = [clip_indices] + [self.matcher(a, clip_targets)
                                          for a in aux_outputs]
        if key is None:
            key = jax.random.PRNGKey(0)
        layer_keys = jax.random.split(key, len(layer_outputs))  # fresh key / layer

        losses = {}

        if 'avism_labels' in self.losses:
            prep = [self._prep_labels(o, clip_targets, ind)
                    for o, ind in zip(layer_outputs, layer_indices)]
            ce_vec = batched_weighted_ce(jnp.stack([p[0] for p in prep]),
                                         jnp.stack([p[1] for p in prep]),
                                         self.empty_weight)
            losses['loss_avism_ce'] = ce_vec[0]
            for i in range(len(aux_outputs)):
                losses[f'loss_avism_ce_{i}'] = ce_vec[i + 1]

        if 'avism_masks' in self.losses:
            prep = [self._prep_masks(o, clip_targets, ind, k)
                    for o, ind, k in zip(layer_outputs, layer_indices, layer_keys)]
            mce_vec, dice_vec = batched_mask_losses(
                jnp.stack([p[0] for p in prep]),
                jnp.stack([p[1] for p in prep]),
                num_masks)
            losses['loss_avism_mask'] = mce_vec[0]
            losses['loss_avism_dice'] = dice_vec[0]
            for i in range(len(aux_outputs)):
                losses[f'loss_avism_mask_{i}'] = mce_vec[i + 1]
                losses[f'loss_avism_dice_{i}'] = dice_vec[i + 1]

        if 'fg_sim' in self.losses:
            losses.update(self.loss_fg_sim(outputs_without_aux, clip_targets,
                                           frame_targets, clip_indices,
                                           frame_indices, num_masks))
        return losses


# ----------------------------------------------------------------------------
if __name__ == "__main__":
    key = jax.random.PRNGKey(0)
    keys = jax.random.split(key, 16)

    L, B, T, cQ, fQ, C, H, W = 1, 2, 2, 8, 8, 32, 16, 16
    num_classes = 4
    n_obj = 2
    n_aux = 2

    outputs = {
        'pred_logits': jax.random.normal(keys[0], (L, B, cQ, num_classes + 1), jnp.float32),
        'pred_masks': jax.random.normal(keys[1], (L, B, cQ, T, H, W), jnp.float32),
        'pred_fq_embed': jax.random.normal(keys[2], (L, B, T, fQ, C), jnp.float32),
        'pred_cq_embed': jax.random.normal(keys[3], (L, B, cQ, C), jnp.float32),
        'aux_outputs': [
            {'pred_logits': jax.random.normal(keys[10 + a], (L, B, cQ, num_classes + 1), jnp.float32),
             'pred_masks': jax.random.normal(keys[12 + a], (L, B, cQ, T, H, W), jnp.float32)}
            for a in range(n_aux)
        ],
    }

    clip_targets = []
    for b in range(B):
        clip_targets.append({
            'labels': jnp.array([b % num_classes, (b + 1) % num_classes], jnp.int32),
            'masks': (jax.random.uniform(keys[4 + b], (n_obj, T, H, W)) > 0.5
                      ).astype(jnp.float32),
            'ids': jnp.array([[0, 0], [1, 1]], jnp.int32),   # (n_obj, T)
        })

    frame_targets = [{'ids': jnp.array([0, 1], jnp.int32)} for _ in range(B * T)]
    frame_indices = [[(jnp.arange(n_obj, dtype=jnp.int32),
                       jnp.arange(n_obj, dtype=jnp.int32))
                      for _ in range(B * T)]]  # L lists of B*T (src, tgt) pairs

    criterion = AvismSetCriterionPallas(
        num_classes=num_classes,
        matcher=IdentityMatcher(),
        weight_dict={'loss_avism_ce': 2.0, 'loss_avism_mask': 5.0,
                     'loss_avism_dice': 5.0, 'loss_clip_sim': 0.5},
        eos_coef=0.1,
        losses=['avism_labels', 'avism_masks', 'fg_sim'],
        num_points=16,
        oversample_ratio=3,
        importance_sample_ratio=0.75,
        sim_use_clip=True,
    )

    losses = criterion.forward(outputs, clip_targets, frame_targets,
                               frame_indices, key=keys[8])
    losses = {k: jax.block_until_ready(v) for k, v in losses.items()}
    expected = {'loss_avism_ce', 'loss_avism_mask', 'loss_avism_dice', 'loss_clip_sim'}
    for i in range(n_aux):
        expected |= {f'loss_avism_ce_{i}', f'loss_avism_mask_{i}', f'loss_avism_dice_{i}'}
    assert expected.issubset(losses.keys())
    for v in losses.values():
        assert jnp.isfinite(v)
    print("KERNEL_OK")
</pallas_src>

<mosaic_0001>
module attributes {stable_mosaic.version = 11 : i64} {
  func.func @_weighted_ce_kernel(%arg0: memref<3x5x16xf32, #tpu.memory_space<vmem>>, %arg1: memref<3x1x16xi32, #tpu.memory_space<vmem>>, %arg2: memref<5x1xf32, #tpu.memory_space<vmem>>, %arg3: memref<3x1xf32, #tpu.memory_space<vmem>>) attributes {dimension_semantics = [], scalar_prefetch = 0 : i64, scratch_operands = 0 : i64, tpu.core_type = #tpu.core_type<tc>} {
    %c0 = arith.constant 0 : index
    %c0_0 = arith.constant 0 : index
    %c0_1 = arith.constant 0 : index
    %0 = vector.load %arg0[%c0, %c0_0, %c0_1] : memref<3x5x16xf32, #tpu.memory_space<vmem>>, vector<3x5x16xf32>
    %c0_2 = arith.constant 0 : index
    %c0_3 = arith.constant 0 : index
    %c0_4 = arith.constant 0 : index
    %1 = vector.load %arg1[%c0_2, %c0_3, %c0_4] : memref<3x1x16xi32, #tpu.memory_space<vmem>>, vector<3x1x16xi32>
    %c0_5 = arith.constant 0 : index
    %c0_6 = arith.constant 0 : index
    %2 = vector.load %arg2[%c0_5, %c0_6] : memref<5x1xf32, #tpu.memory_space<vmem>>, vector<5x1xf32>
    %3 = tpu.iota {dimensions = array<i32: 1>} : vector<3x5x16xi32>
    %4 = vector.broadcast %1 : vector<3x1x16xi32> to vector<3x5x16xi32>
    %5 = arith.cmpi eq, %3, %4 : vector<3x5x16xi32>
    %6 = arith.extui %5 : vector<3x5x16xi1> to vector<3x5x16xi32>
    %7 = arith.sitofp %6 : vector<3x5x16xi32> to vector<3x5x16xf32>
    %cst = arith.constant dense<0xFF800000> : vector<3x16xf32>
    %8 = vector.multi_reduction <maximumf>, %0, %cst [1] : vector<3x5x16xf32> to vector<3x16xf32>
    %9 = vector.shape_cast %8 : vector<3x16xf32> to vector<3x1x16xf32>
    %10 = vector.broadcast %9 : vector<3x1x16xf32> to vector<3x5x16xf32>
    %11 = arith.subf %0, %10 : vector<3x5x16xf32>
    %12 = math.exp %11 : vector<3x5x16xf32>
    %cst_7 = arith.constant dense<0.000000e+00> : vector<3x16xf32>
    %13 = vector.multi_reduction <add>, %12, %cst_7 [1] : vector<3x5x16xf32> to vector<3x16xf32>
    %14 = vector.shape_cast %13 : vector<3x16xf32> to vector<3x1x16xf32>
    %15 = math.log %14 : vector<3x1x16xf32>
    %16 = arith.addf %9, %15 : vector<3x1x16xf32>
    %17 = arith.mulf %7, %0 : vector<3x5x16xf32>
    %cst_8 = arith.constant dense<0.000000e+00> : vector<3x16xf32>
    %18 = vector.multi_reduction <add>, %17, %cst_8 [1] : vector<3x5x16xf32> to vector<3x16xf32>
    %19 = vector.shape_cast %18 : vector<3x16xf32> to vector<3x1x16xf32>
    %20 = vector.shape_cast %2 : vector<5x1xf32> to vector<1x5x1xf32>
    %21 = vector.broadcast %20 : vector<1x5x1xf32> to vector<3x5x16xf32>
    %22 = arith.mulf %7, %21 : vector<3x5x16xf32>
    %cst_9 = arith.constant dense<0.000000e+00> : vector<3x16xf32>
    %23 = vector.multi_reduction <add>, %22, %cst_9 [1] : vector<3x5x16xf32> to vector<3x16xf32>
    %24 = vector.shape_cast %23 : vector<3x16xf32> to vector<3x1x16xf32>
    %25 = arith.subf %16, %19 : vector<3x1x16xf32>
    %26 = arith.mulf %24, %25 : vector<3x1x16xf32>
    %cst_10 = arith.constant dense<0.000000e+00> : vector<3x1xf32>
    %27 = vector.multi_reduction <add>, %26, %cst_10 [2] : vector<3x1x16xf32> to vector<3x1xf32>
    %cst_11 = arith.constant dense<0.000000e+00> : vector<3x1xf32>
    %28 = vector.multi_reduction <add>, %24, %cst_11 [2] : vector<3x1x16xf32> to vector<3x1xf32>
    %29 = arith.divf %27, %28 : vector<3x1xf32>
    %c0_12 = arith.constant 0 : index
    %c0_13 = arith.constant 0 : index
    %30 = vector.load %arg3[%c0_12, %c0_13] : memref<3x1xf32, #tpu.memory_space<vmem>>, vector<3x1xf32>
    tpu.vector_store %arg3[%c0_12, %c0_13], %29 {strides = array<i32>} : memref<3x1xf32, #tpu.memory_space<vmem>>, vector<3x1xf32>,
    return
  }
}

</mosaic_0001>

<bundles_post_ra>
// kernel: tpu_custom_call.1
= control target key start
LH: loop header
LB: loop body
LE: loop exit
PB: predicated region body
PF: predicated region fallthrough
CT: control target
= control target key end

     0   :  { %v230_v0 = vmov 0   ;;  %vm44_vm0 = vcmask 126976   ;;  %v21_v35 = vlaneseq  ;;  %v231_v48 = vmov 0.0   ;;  %s311_s2 = inlined_call_operand.vmem [shape: f32[5,1], index: 2, kind: input, shape index: {}]   ;;  %s312_s0 = inlined_call_operand.vmem [shape: f32[3,5,16], index: 0, kind: input, shape index: {}]   ;;  %s313_s1 = inlined_call_operand.vmem [shape: s32[3,1,16], index: 1, kind: input, shape index: {}]   ;;  %s314_s3 = inlined_call_operand.vmem [shape: f32[3,1], index: 3, kind: output, shape index: {}]  }
   0x1   :  { %211 = vset.pattern.permute.xlu0 %v230_v0  ;;  %v20_v1 = vld [vmem:[%s311_s2] sm:$0x1f]  ;;  %v15_v3 = vld [vmem:[%s312_s0 + $0x8] sm:$0x1f]  ;;  %v266_v7 = vld [vmem:[%s312_s0 + $0x10] sm:$0x1f] }
   0x2   :  { %131 = vperm.xlu0 %211, %v20_v1   ;;  %v14_v2 = vld [vmem:[%s312_s0] sm:$0x1f]  ;;  %v52_v6 = vsel %vm44_vm0, %v15_v3, -inf  ;;  %v59_v10 = vsel %vm44_vm0, %v266_v7, -inf  ;;  %v22_v39 = vshrl.u32 %v21_v35, 7  ;;  %vm164_vm4 = vcmask 130048  }
   0x3   :  { %v45_v4 = vsel %vm44_vm0, %v14_v2, -inf  ;;  %v53_v8 = vrot.slane %v52_v6, 4  ;;  %v60_v12 = vrot.slane %v59_v10, 4  ;;  %v203_v41 = vld [vmem:[%s313_s1] ss:$0 sm:$0xff]  ;;  %vm192_vm5 = vcmask 1041409  }
   0x4   :  { %v46_v5 = vrot.slane %v45_v4, 4  ;;  %v204_v44 = vld [vmem:[%s313_s1 + $0x1] ss:$0 sm:$0xff]  ;;  %vm35_vm1 = vcmp.eq.s32.totalorder %v22_v39, %v203_v41  ;;  %v205_v50 = vld [vmem:[%s313_s1 + $0x2] ss:$0 sm:$0xff]  ;;  %vm194_vm6 = vcmask 1042434  }
   0x5   :  { %v54_v11 = vmax.f32 %v52_v6, %v53_v8  ;;  %v61_v14 = vmax.f32 %v59_v10, %v60_v12  ;;  %vm36_vm2 = vcmp.eq.s32.totalorder %v22_v39, %v204_v44  ;;  %v206_v49 = vsel %vm35_vm1, 1.0, %v231_v48 }
   0x6   :  { %v47_v9 = vmax.f32 %v45_v4, %v46_v5  ;;  %v207_v54 = vsel %vm36_vm2, 1.0, %v231_v48  ;;  %v105_v55 = vmul.f32 %v206_v49, %v14_v2  ;;  %vm37_vm3 = vcmp.eq.s32.totalorder %v22_v39, %v205_v50 }
   0x7   :  { %v55_v15 = vrot.slane %v54_v11, 2  ;;  %v62_v18 = vrot.slane %v61_v14, 2  ;;  %v106_v58 = vmul.f32 %v207_v54, %v15_v3  ;;  %v208_v60 = vsel %vm37_vm3, 1.0, %v231_v48 }
   0x8   :  { %v48_v13 = vrot.slane %v47_v9, 2  ;;  %v108_v61 = vsel %vm44_vm0, %v105_v55, 0.0  ;;  %v107_v0 = vmul.f32 %v208_v60, %v266_v7  ;;  %vm197_vm7 = vcmask 2048  }
   0x9   :  { %v56_v17 = vmax.f32 %v54_v11, %v55_v15  ;;  %v63_v21 = vmax.f32 %v61_v14, %v62_v18  ;;  %v109_v1 = vrot.slane %v108_v61, 4  ;;  %v115_v4 = vsel %vm44_vm0, %v106_v58, 0.0 }
   0xa   :  { %v49_v16 = vmax.f32 %v47_v9, %v48_v13  ;;  %v116_v6 = vrot.slane %v115_v4, 4  ;;  %v122_v10 = vsel %vm44_vm0, %v107_v0, 0.0 }
   0xb   :  { %v57_v20 = vrot.slane %v56_v17, 1  ;;  %v64_v24 = vrot.slane %v63_v21, 1  ;;  %v123_v11 = vrot.slane %v122_v10, 4 }
   0xc   :  { %v50_v19 = vrot.slane %v49_v16, 1 }
   0xd   :  { %v272_v23 = vmax.f32 %v56_v17, %v57_v20  ;;  %v276_v27 = vmax.f32 %v63_v21, %v64_v24  ;;  %v124_v17 = vadd.f32 %v123_v11, %v122_v10 }
   0xe   :  { %v270_v22 = vmax.f32 %v49_v16, %v50_v19 }
   0xf   :  { %v67_v26 = vsub.f32 %v15_v3, %v272_v23  ;;  %v68_v30 = vsub.f32 %v266_v7, %v276_v27  ;;  %v117_v3 = vadd.f32 %v116_v6, %v115_v4  ;;  %v125_v35 = vrot.slane %v124_v17, 2 }
  0x10   :  { %v66_v25 = vsub.f32 %v14_v2, %v270_v22  ;;  %v110_v2 = vadd.f32 %v109_v1, %v108_v61 }
  0x11   :  { %v71_v29 = vmul.f32 1.442695, %v67_v26  ;;  %v73_v31 = vmul.f32 1.442695, %v68_v30  ;;  %v118_v18 = vrot.slane %v117_v3, 2 }
  0x12   :  { %v69_v28 = vmul.f32 1.442695, %v66_v25  ;;  %v111_v13 = vrot.slane %v110_v2, 2 }
  0x14   :  { %212 = vpow2.f32 %v69_v28  ;;  %v112_v24 = vadd.f32 %v111_v13, %v110_v2 }
  0x15   :  { %214 = vpow2.f32 %v71_v29 }
  0x16   :  { %216 = vpow2.f32 %v73_v31 }
  0x1e   :  { %v213_v32 = vpop.eup %212 }
  0x1f   :  { %v215_v33 = vpop.eup %214  ;;  %v75_v34 = vsel %vm44_vm0, %v213_v32, 0.0 }
  0x20   :  { %v76_v36 = vrot.slane %v75_v34, 4  ;;  %v82_v37 = vsel %vm44_vm0, %v215_v33, 0.0  ;;  %v217_v38 = vpop.eup %216  ;;  %v113_v33 = vrot.slane %v112_v24, 1 }
  0x21   :  { %v83_v40 = vrot.slane %v82_v37, 4  ;;  %v89_v43 = vsel %vm44_vm0, %v217_v38, 0.0 }
  0x22   :  { %v77_v42 = vadd.f32 %v76_v36, %v75_v34  ;;  %v90_v46 = vrot.slane %v89_v43, 4  ;;  %v119_v34 = vadd.f32 %v118_v18, %v117_v3  ;;  %v114_v44 = vadd.f32 %v113_v33, %v112_v24 }
  0x23   :  { %v84_v45 = vadd.f32 %v83_v40, %v82_v37 }
  0x24   :  { %v78_v47 = vrot.slane %v77_v42, 2  ;;  %v91_v52 = vadd.f32 %v90_v46, %v89_v43  ;;  %v120_v46 = vrot.slane %v119_v34, 1 }
  0x25   :  { %v85_v51 = vrot.slane %v84_v45, 2 }
  0x26   :  { %v79_v53 = vadd.f32 %v78_v47, %v77_v42  ;;  %v92_v57 = vrot.slane %v91_v52, 2  ;;  %v126_v47 = vadd.f32 %v125_v35, %v124_v17 }
  0x27   :  { %v86_v56 = vadd.f32 %v85_v51, %v84_v45 }
  0x28   :  { %v80_v59 = vrot.slane %v79_v53, 1  ;;  %v93_v63 = vadd.f32 %v92_v57, %v91_v52  ;;  %v127_v58 = vrot.slane %v126_v47, 1 }
  0x29   :  { %v87_v62 = vrot.slane %v86_v56, 1 }
  0x2a   :  { %v81_v5 = vadd.f32 %v80_v59, %v79_v53  ;;  %v94_v9 = vrot.slane %v93_v63, 1 }
  0x2b   :  { %v88_v8 = vadd.f32 %v87_v62, %v86_v56  ;;  %v121_v56 = vadd.f32 %v120_v46, %v119_v34 }
  0x2c   :  { %218 = vlog2.f32 %v81_v5  ;;  %v95_v12 = vadd.f32 %v94_v9, %v93_v63  ;;  %v128_v63 = vadd.f32 %v127_v58, %v126_v47 }
  0x2d   :  { %220 = vlog2.f32 %v88_v8 }
  0x2e   :  { %222 = vlog2.f32 %v95_v12 }
  0x36   :  { %v219_v29 = vpop.eup %218 }
  0x37   :  { %v221_v36 = vpop.eup %220  ;;  %v97_v40 = vmul.f32 0.6931472, %v219_v29 }
  0x38   :  { %v99_v45 = vmul.f32 0.6931472, %v221_v36  ;;  %v223_v48 = vpop.eup %222 }
  0x39   :  { %v102_v52 = vadd.f32 %v97_v40, %v270_v22  ;;  %v101_v57 = vmul.f32 0.6931472, %v223_v48 }
  0x3a   :  { %v103_v55 = vadd.f32 %v99_v45, %v272_v23 }
  0x3b   :  { %v158_v62 = vsub.f32 %v102_v52, %v114_v44  ;;  %v104_v4 = vadd.f32 %v101_v57, %v276_v27 }
  0x3c   :  { %v159_v1 = vsub.f32 %v103_v55, %v121_v56 }
  0x3d   :  { %v160_v6 = vsub.f32 %v104_v4, %v128_v63 }
  0x81   :  { %v132_v14 = vpop.permute.xlu0 %131 }
  0x82   :  { %v134_v15 = vmul.f32 %v206_v49, %v132_v14  ;;  %v135_v16 = vmul.f32 %v207_v54, %v132_v14  ;;  %v136_v7 = vmul.f32 %v208_v60, %v132_v14 }
  0x84   :  { %v137_v19 = vsel %vm44_vm0, %v134_v15, 0.0  ;;  %v144_v20 = vsel %vm44_vm0, %v135_v16, 0.0  ;;  %v151_v21 = vsel %vm44_vm0, %v136_v7, 0.0 }
  0x85   :  { %v138_v25 = vrot.slane %v137_v19, 4  ;;  %v145_v26 = vrot.slane %v144_v20, 4  ;;  %v152_v28 = vrot.slane %v151_v21, 4 }
  0x87   :  { %v146_v30 = vadd.f32 %v145_v26, %v144_v20  ;;  %v139_v31 = vadd.f32 %v138_v25, %v137_v19  ;;  %v153_v32 = vadd.f32 %v152_v28, %v151_v21 }
  0x89   :  { %v147_v37 = vrot.slane %v146_v30, 2  ;;  %v140_v38 = vrot.slane %v139_v31, 2  ;;  %v154_v39 = vrot.slane %v153_v32, 2 }
  0x8b   :  { %v148_v41 = vadd.f32 %v147_v37, %v146_v30  ;;  %v141_v42 = vadd.f32 %v140_v38, %v139_v31  ;;  %v155_v43 = vadd.f32 %v154_v39, %v153_v32 }
  0x8d   :  { %v149_v49 = vrot.slane %v148_v41, 1  ;;  %v142_v50 = vrot.slane %v141_v42, 1  ;;  %v156_v51 = vrot.slane %v155_v43, 1 }
  0x8f   :  { %v150_v53 = vadd.f32 %v149_v49, %v148_v41  ;;  %v143_v54 = vadd.f32 %v142_v50, %v141_v42  ;;  %v157_v61 = vadd.f32 %v156_v51, %v155_v43 }
  0x91   :  { %v177_v59 = vsel %vm164_vm4, %v150_v53, 0.0  ;;  %v174_v60 = vsel %vm164_vm4, %v143_v54, 0.0  ;;  %v180_v0 = vsel %vm164_vm4, %v157_v61, 0.0  ;;  %v161_v22 = vmul.f32 %v158_v62, %v143_v54 }
  0x92   :  { %178 = vadd.xlane.f32.xlu1 %v177_v59  ;;  %175 = vadd.xlane.f32.xlu0 %v174_v60  ;;  %v162_v5 = vmul.f32 %v159_v1, %v150_v53  ;;  %v163_v9 = vmul.f32 %v160_v6, %v157_v61 }
  0x93   :  { %v165_v23 = vsel %vm164_vm4, %v161_v22, 0.0 }
  0x94   :  { %v168_v8 = vsel %vm164_vm4, %v162_v5, 0.0  ;;  %v171_v2 = vsel %vm164_vm4, %v163_v9, 0.0 }
  0x96   :  { %181 = vadd.xlane.f32.xlu1 %v180_v0 }
  0x9a   :  { %166 = vadd.xlane.f32.xlu1 %v165_v23 }
  0x9e   :  { %169 = vadd.xlane.f32.xlu1 %v168_v8 }
  0xa2   :  { %172 = vadd.xlane.f32.xlu1 %v171_v2 }
 0x11f   :  { %v179_v10 = vpop.xlane.xlu1 %178  ;;  %v176_v3 = vpop.xlane.xlu0 %175 }
 0x120   :  { %224 = vrcp.f32 %v179_v10 }
 0x121   :  { %226 = vrcp.f32 %v176_v3 }
 0x123   :  { %v182_v11 = vpop.xlane.xlu1 %181 }
 0x124   :  { %228 = vrcp.f32 %v182_v11 }
 0x127   :  { %v167_v27 = vpop.xlane.xlu1 %166 }
 0x12a   :  { %v225_v12 = vpop.eup %224 }
 0x12b   :  { %v227_v13 = vpop.eup %226  ;;  %v170_v14 = vpop.xlane.xlu1 %169 }
 0x12c   :  { %v184_v15 = vmul.f32 %v227_v13, %v167_v27  ;;  %v186_v16 = vmul.f32 %v225_v12, %v170_v14 }
 0x12e   :  { %v229_v7 = vpop.eup %228  ;;  %v193_v19 = vsel %vm192_vm5, %v186_v16, %v184_v15 }
 0x12f   :  { %v173_v17 = vpop.xlane.xlu1 %172 }
 0x130   :  { %v188_v18 = vmul.f32 %v229_v7, %v173_v17 }
 0x132   :  { %v195_v20 = vsel %vm194_vm6, %v188_v18, %v193_v19 }
 0x133   :  { %198 = vst.msk [vmem:[%s314_s3] sm:$0x7] %vm197_vm7, %v195_v20 }

</bundles_post_ra>
